<compile_context>
chip_gen: v7x
topology: tpu7x:2x2x1
jax: 0.10.0
libtpu: 0.0.40
codegen_flags: <defaults>
</compile_context>

<pallas_src>
import jax
import jax.numpy as jnp
from jax import lax
from jax.experimental import pallas as pl
from jax.experimental.pallas import tpu as pltpu


def _conv3x3_relu_kernel(p_ref, w_ref, o_ref):
    # p_ref: (9*C, TM) transposed im2col tile, w_ref: (Cout, 9*C), o_ref: (Cout, TM)
    acc = jnp.dot(w_ref[...], p_ref[...], preferred_element_type=jnp.float32)
    o_ref[...] = jnp.maximum(acc, 0.0).astype(o_ref.dtype)


def distillator_forward(x, weight, *, max_lane_tile=1024):
    """ReLU(conv2d(x, weight, stride=1, padding=1, no bias)).  NCHW in / NCHW out.

    x:      (N, C, H, W)      -- PyTorch activation layout
    weight: (Cout, C, 3, 3)   -- PyTorch Conv2d weight layout (OIHW)
    """
    N, C, H, W = x.shape
    Cout, Cw, KH, KW = weight.shape
    assert (Cw, KH, KW) == (C, 3, 3)

    HW = H * W
    K = 9 * C

    # ---- transposed im2col straight from NCHW (layout plumbing, not compute) -------
    # patches_t[n, k, h*W+w] = x_pad[n, c, h+dy, w+dx]  with k = (dy*3+dx)*C + c
    x_pad = jnp.pad(x, ((0, 0), (0, 0), (1, 1), (1, 1)))            # (N, C, H+2, W+2)
    taps = [x_pad[:, :, dy:dy + H, dx:dx + W].reshape(N, C, HW)
            for dy in range(3) for dx in range(3)]
    patches_t = jnp.concatenate(taps, axis=1)                        # (N, 9C, HW)

    # Weight (Cout, C, 3, 3) -> (Cout, 3, 3, C) -> (Cout, 9C); k ordering matches above.
    w2 = jnp.transpose(weight, (0, 2, 3, 1)).reshape(Cout, K)

    # ---- lane-dense tiling of the H*W axis -----------------------------------------
    HW_pad = pl.cdiv(HW, 128) * 128
    if HW_pad != HW:
        patches_t = jnp.pad(patches_t, ((0, 0), (0, 0), (0, HW_pad - HW)))

    # Largest lane tile (multiple of 128) that divides HW_pad, capped at max_lane_tile.
    n128 = HW_pad // 128
    tmax = max(1, min(n128, max_lane_tile // 128))
    t = next(d for d in range(tmax, 0, -1) if n128 % d == 0)
    tm = 128 * t
    grid = (N, HW_pad // tm)

    itemsize = jnp.dtype(x.dtype).itemsize
    cost = pl.CostEstimate(
        flops=2 * N * HW_pad * K * Cout,
        transcendentals=0,
        bytes_accessed=(N * K * HW_pad + Cout * K + N * Cout * HW_pad) * itemsize,
    )

    out3d = pl.pallas_call(
        _conv3x3_relu_kernel,
        out_shape=jax.ShapeDtypeStruct((N, Cout, HW_pad), x.dtype),
        grid_spec=pltpu.PrefetchScalarGridSpec(
            num_scalar_prefetch=0,
            grid=grid,
            in_specs=[
                # transposed patch tile: lanes = H*W tile (dense), sublanes = 9*C (full)
                pl.BlockSpec((None, K, tm), lambda n, j: (n, 0, j)),
                # weights: whole-array resident block (index_map constant)
                pl.BlockSpec((Cout, K), lambda n, j: (0, 0)),
            ],
            # output tile in final NCHW layout: lanes = H*W tile (multiple of 128)
            out_specs=pl.BlockSpec((None, Cout, tm), lambda n, j: (n, 0, j)),
        ),
        compiler_params=pltpu.CompilerParams(
            dimension_semantics=("parallel", "parallel"),
            vmem_limit_bytes=32 * 1024 * 1024,
        ),
        cost_estimate=cost,
    )(patches_t, w2)

    if HW_pad != HW:
        out3d = out3d[:, :, :HW]
    return out3d.reshape(N, Cout, H, W)                              # NCHW, no transpose


if __name__ == "__main__":
    key = jax.random.PRNGKey(0)
    kx, kw = jax.random.split(key)

    N, Cin, H, W = 2, 4, 16, 16
    Cout = 500
    x = jax.random.normal(kx, (N, Cin, H, W), dtype=jnp.float32)
    w = jax.random.normal(kw, (Cout, Cin, 3, 3), dtype=jnp.float32) * 0.1

    y = jax.block_until_ready(jax.jit(distillator_forward)(x, w))

    # Pure-JAX reference: Conv2d(3x3, padding=1, bias=False) + ReLU in NCHW.
    ref = lax.conv_general_dilated(
        x, w, window_strides=(1, 1), padding="SAME",
        dimension_numbers=("NCHW", "OIHW", "NCHW"),
    )
    ref = jnp.maximum(ref, 0.0)

    assert y.shape == (N, Cout, H, W) and y.dtype == x.dtype
    # Tolerance relaxed vs. v1: the kernel now uses default (MXU-native) matmul precision.
    assert jnp.allclose(y, ref, atol=2e-2, rtol=2e-2)
    print("KERNEL_OK")
</pallas_src>

<mosaic_0001>
module attributes {stable_mosaic.version = 11 : i64} {
  func.func @_conv3x3_relu_kernel(%arg0: i32, %arg1: i32, %arg2: memref<1x36x256xf32, #tpu.memory_space<vmem>>, %arg3: memref<500x36xf32, #tpu.memory_space<vmem>>, %arg4: memref<1x500x256xf32, #tpu.memory_space<vmem>>) attributes {dimension_semantics = [#tpu.dimension_semantics<parallel>, #tpu.dimension_semantics<parallel>], iteration_bounds = array<i64: 2, 1>, scalar_prefetch = 0 : i64, scratch_operands = 0 : i64, tpu.core_type = #tpu.core_type<tc>, window_params = [{transform_indices = @transform_0, window_bounds = array<i64: 1, 36, 256>}, {pipeline_mode = #tpu.pipeline_mode<synchronous>, transform_indices = @transform_1, window_bounds = array<i64: 500, 36>}, {transform_indices = @transform_2, window_bounds = array<i64: 1, 500, 256>}]} {
    %c0 = arith.constant 0 : index
    %c0_0 = arith.constant 0 : index
    %0 = vector.load %arg3[%c0, %c0_0] : memref<500x36xf32, #tpu.memory_space<vmem>>, vector<500x36xf32>
    %c0_1 = arith.constant 0 : index
    %c0_2 = arith.constant 0 : index
    %c0_3 = arith.constant 0 : index
    %1 = vector.load %arg2[%c0_1, %c0_2, %c0_3] : memref<1x36x256xf32, #tpu.memory_space<vmem>>, vector<1x36x256xf32>
    %2 = vector.shape_cast %1 : vector<1x36x256xf32> to vector<36x256xf32>
    %cst = arith.constant dense<0.000000e+00> : vector<500x256xf32>
    %3 = tpu.matmul %0, %2, %cst {dimension_numbers = #tpu.dot_dimension_numbers<[1], [0], [0], [1], [0, 0, 1, 1], [], []>} : vector<500x36xf32>, vector<36x256xf32>, vector<500x256xf32> -> vector<500x256xf32>
    %cst_4 = arith.constant 0.000000e+00 : f32
    %4 = vector.broadcast %cst_4 : f32 to vector<500x256xf32>
    %5 = arith.maximumf %3, %4 : vector<500x256xf32>
    %c0_5 = arith.constant 0 : index
    %c0_6 = arith.constant 0 : index
    %c0_7 = arith.constant 0 : index
    %6 = vector.load %arg4[%c0_5, %c0_6, %c0_7] : memref<1x500x256xf32, #tpu.memory_space<vmem>>, vector<1x500x256xf32>
    %7 = vector.shape_cast %6 : vector<1x500x256xf32> to vector<500x256xf32>
    %8 = vector.shape_cast %5 : vector<500x256xf32> to vector<1x500x256xf32>
    tpu.vector_store %arg4[%c0_5, %c0_6, %c0_7], %8 {strides = array<i32>} : memref<1x500x256xf32, #tpu.memory_space<vmem>>, vector<1x500x256xf32>,
    return
  }
  func.func @transform_0(%arg0: i32, %arg1: i32) -> (i32, i32, i32) {
    %c0_i32 = arith.constant 0 : i32
    %c0_i32_0 = arith.constant 0 : i32
    return %arg0, %c0_i32, %arg1 : i32, i32, i32
  }
  func.func @transform_1(%arg0: i32, %arg1: i32) -> (i32, i32) {
    %c0_i32 = arith.constant 0 : i32
    %c0_i32_0 = arith.constant 0 : i32
    %c0_i32_1 = arith.constant 0 : i32
    return %c0_i32, %c0_i32_0 : i32, i32
  }
  func.func @transform_2(%arg0: i32, %arg1: i32) -> (i32, i32, i32) {
    %c0_i32 = arith.constant 0 : i32
    %c0_i32_0 = arith.constant 0 : i32
    return %arg0, %c0_i32, %arg1 : i32, i32, i32
  }
}

</mosaic_0001>

<bundles_post_ra>
// kernel: distillator_forward.1
= control target key start
LH: loop header
LB: loop body
LE: loop exit
PB: predicated region body
PF: predicated region fallthrough
CT: control target
= control target key end

     0   :  { %s1390_s9 = smov 0   ;;  %s1392_s10 = smov 0   ;;  %s1870_s0 = inlined_call_operand.vmem [shape: f32[2,36,256], index: 0, kind: input, shape index: {}]   ;;  %s1871_s1 = inlined_call_operand.vmem [shape: f32[500,36], index: 1, kind: input, shape index: {}]   ;;  %s1872_s2 = inlined_call_operand.vmem [shape: f32[2,500,256], index: 2, kind: output, shape index: {}]  }
   0x1   :  { %s1394_s11 = smov 0  }
   0x2 LB: > { %s24_s12 = sadd.s32 1, %s1368_s10  ;;  %p1239_p0 = scmp.ge.s32.totalorder %s1372_s11, 1  ;;  %s1372_s11 = sphi %s1394_s11, %s12_s11   ;;  %s1368_s10 = sphi %s1392_s10, %s1874_s10   ;;  %s1364_s9 = sphi %s1390_s9, %s1873_s9  }
   0x3   : > { %p26_p1 = scmp.ge.s32.totalorder %s24_s12, 2  ;;  %p133_p2 = scmp.lt.s32.totalorder %s1372_s11, 3 }
   0x5   : > { %s1876_s12 = smov (%p26_p1, %s24_s12), 0  ;;  %p134_p3 = pnand %p1239_p0, %p133_p2 }
   0x6   : > { %p164_p4 = scmp.lt.s32.totalorder (!%p134_p3), %s1364_s9, 1  ;;  %v1374_v0 = vmov (!%p134_p3), 0.0   ;;  %vm446_vm0 = vcmask (!%p134_p3), 1043456   ;;  %v183_v15 = vld [vmem:[%s1871_s1] sm:$0xff] (!%p134_p3)  ;;  %vm256_vm1 = vcmask (!%p134_p3), 293888   ;;  %v184_v17 = vld [vmem:[%s1871_s1 + $0x8] sm:$0xff] (!%p134_p3) }
   0x7   : > { %137 = sbr.rel (%p134_p3) target bundleno = 371 (0x173), region = 28  ;;  %517 = vmatprep.mubr.f32.mxu0 (!%p134_p3), %v1374_v0  ;;  %709 = vmatprep.mubr.f32.mxu1 (!%p134_p3), %v1374_v0  ;;  %v215_v16 = vld [vmem:[%s1871_s1 + $0x100] sm:$0xff] (!%p134_p3)  ;;  %v216_v18 = vld [vmem:[%s1871_s1 + $0x108] sm:$0xff] (!%p134_p3)  ;;  %v185_v19 = vld [vmem:[%s1871_s1 + $0x10] sm:$0xff] (!%p134_p3) }
   0x8   : > { %v217_v20 = vld [vmem:[%s1871_s1 + $0x110] sm:$0xff] (!%p134_p3)  ;;  %v186_v21 = vld [vmem:[%s1871_s1 + $0x18] sm:$0xff] (!%p134_p3)  ;;  %v187_v23 = vld [vmem:[%s1871_s1 + $0x20] sm:$0xff] (!%p134_p3) }
   0x9   : > { %v218_v22 = vld [vmem:[%s1871_s1 + $0x118] sm:$0xff] (!%p134_p3)  ;;  %v219_v24 = vld [vmem:[%s1871_s1 + $0x120] sm:$0xff] (!%p134_p3)  ;;  %v188_v25 = vld [vmem:[%s1871_s1 + $0x28] sm:$0xff] (!%p134_p3) }
   0xa   : > { %v220_v26 = vld [vmem:[%s1871_s1 + $0x128] sm:$0xff] (!%p134_p3)  ;;  %v189_v27 = vld [vmem:[%s1871_s1 + $0x30] sm:$0xff] (!%p134_p3)  ;;  %v190_v29 = vld [vmem:[%s1871_s1 + $0x38] sm:$0xff] (!%p134_p3) }
   0xb   : > { %v221_v28 = vld [vmem:[%s1871_s1 + $0x130] sm:$0xff] (!%p134_p3)  ;;  %v222_v30 = vld [vmem:[%s1871_s1 + $0x138] sm:$0xff] (!%p134_p3)  ;;  %v191_v31 = vld [vmem:[%s1871_s1 + $0x40] sm:$0xff] (!%p134_p3) }
   0xc   : > { %v223_v32 = vld [vmem:[%s1871_s1 + $0x140] sm:$0xff] (!%p134_p3)  ;;  %v192_v33 = vld [vmem:[%s1871_s1 + $0x48] sm:$0xff] (!%p134_p3)  ;;  %v193_v35 = vld [vmem:[%s1871_s1 + $0x50] sm:$0xff] (!%p134_p3) }
   0xd   : > { %v224_v34 = vld [vmem:[%s1871_s1 + $0x148] sm:$0xff] (!%p134_p3)  ;;  %v225_v36 = vld [vmem:[%s1871_s1 + $0x150] sm:$0xff] (!%p134_p3)  ;;  %v194_v37 = vld [vmem:[%s1871_s1 + $0x58] sm:$0xff] (!%p134_p3) }
   0xe   : > { %s1878_s9 = smov (!%p164_p4, %s1364_s9), 1  ;;  %v226_v38 = vld [vmem:[%s1871_s1 + $0x158] sm:$0xff]  ;;  %v195_v39 = vld [vmem:[%s1871_s1 + $0x60] sm:$0xff]  ;;  %v196_v41 = vld [vmem:[%s1871_s1 + $0x68] sm:$0xff] }
   0xf   : > { %s1323_s13 = smul.u32 80, %s1878_s9  ;;  %v227_v40 = vld [vmem:[%s1871_s1 + $0x160] sm:$0xff]  ;;  %v228_v42 = vld [vmem:[%s1871_s1 + $0x168] sm:$0xff]  ;;  %v197_v43 = vld [vmem:[%s1871_s1 + $0x70] sm:$0xff] }
  0x10   : > { %v229_v44 = vld [vmem:[%s1871_s1 + $0x170] sm:$0xff]  ;;  %v198_v45 = vld [vmem:[%s1871_s1 + $0x78] sm:$0xff]  ;;  %v199_v47 = vld [vmem:[%s1871_s1 + $0x80] sm:$0xff]  ;;  %s1324_s23 = smul.u32 1008, %s1878_s9 }
  0x11   : > { %s171_s16 = scalar_lea.vmem %s1870_s0, %s1323_s13  ;;  %v230_v46 = vld [vmem:[%s1871_s1 + $0x178] sm:$0xff]  ;;  %v231_v48 = vld [vmem:[%s1871_s1 + $0x180] sm:$0xff]  ;;  %v200_v49 = vld [vmem:[%s1871_s1 + $0x88] sm:$0xff] }
  0x12   : > { %v247_v1 = vld [vmem:[%s171_s16 + $0x8] sm:$0xff]  ;;  %v249_v2 = vld [vmem:[%s171_s16 + $0x18] sm:$0xff]  ;;  %v246_v3 = vld [vmem:[%s171_s16] sm:$0xff]  ;;  %s1733_s26 = scalar_lea.vmem %s1872_s2, %s1324_s23 }
  0x13   : > { %v1309_v4 = vpack.c.bf16 %v249_v2, %v247_v1  ;;  %v248_v5 = vld [vmem:[%s171_s16 + $0x10] sm:$0xff]  ;;  %v251_v6 = vld [vmem:[%s171_s16 + $0x28] sm:$0xff]  ;;  %v253_v7 = vld [vmem:[%s171_s16 + $0x38] sm:$0xff] }
  0x14   : > { %v1311_v8 = vpack.c.bf16 %v248_v5, %v246_v3  ;;  %v1313_v9 = vpack.c.bf16 %v253_v7, %v251_v6  ;;  %v250_v10 = vld [vmem:[%s171_s16 + $0x20] sm:$0xff]  ;;  %v252_v11 = vld [vmem:[%s171_s16 + $0x30] sm:$0xff]  ;;  %v255_v13 = vld [vmem:[%s171_s16 + $0x48] sm:$0xf] }
  0x15   : > { %1310 = vmatprep.subr.bf16.mxu0 %v1309_v4  ;;  %1317 = vmatprep.subr.bf16.mxu1 %v1309_v4  ;;  %v1315_v12 = vpack.c.bf16 %v252_v11, %v250_v10  ;;  %v254_v14 = vld [vmem:[%s171_s16 + $0x40] sm:$0xf]  ;;  %v232_v50 = vld [vmem:[%s1871_s1 + $0x188] sm:$0xff]  ;;  %v201_v51 = vld [vmem:[%s1871_s1 + $0x90] sm:$0xff] }
  0x16   : > { %1312 = vmatpush1.bf16.msra.mxu0 %v1311_v8  ;;  %1320 = vmatpush1.bf16.msra.mxu1 %v1311_v8  ;;  %v233_v52 = vld [vmem:[%s1871_s1 + $0x190] sm:$0xff]  ;;  %v202_v53 = vld [vmem:[%s1871_s1 + $0x98] sm:$0xff]  ;;  %v203_v55 = vld [vmem:[%s1871_s1 + $0xa0] sm:$0xff] }
  0x17   : > { %1314 = vmatprep.subr.bf16.mxu0 %v1313_v9  ;;  %1318 = vmatprep.subr.bf16.mxu1 %v1313_v9  ;;  %v234_v54 = vld [vmem:[%s1871_s1 + $0x198] sm:$0xff]  ;;  %v235_v56 = vld [vmem:[%s1871_s1 + $0x1a0] sm:$0xff]  ;;  %v204_v57 = vld [vmem:[%s1871_s1 + $0xa8] sm:$0xff] }
  0x18   : > { %v236_v58 = vld [vmem:[%s1871_s1 + $0x1a8] sm:$0xff]  ;;  %v205_v59 = vld [vmem:[%s1871_s1 + $0xb0] sm:$0xff]  ;;  %v206_v61 = vld [vmem:[%s1871_s1 + $0xb8] sm:$0xff] }
  0x19   : > { %v237_v60 = vld [vmem:[%s1871_s1 + $0x1b0] sm:$0xff]  ;;  %v238_v62 = vld [vmem:[%s1871_s1 + $0x1b8] sm:$0xff]  ;;  %v207_v63 = vld [vmem:[%s1871_s1 + $0xc0] sm:$0xff] }
  0x1a   : > { %1316 = vmatpush1.bf16.msra.mxu0 %v1315_v12  ;;  %1321 = vmatpush1.bf16.msra.mxu1 %v1315_v12  ;;  %v239_v1 = vld [vmem:[%s1871_s1 + $0x1c0] sm:$0xff]  ;;  %v208_v2 = vld [vmem:[%s1871_s1 + $0xc8] sm:$0xff]  ;;  %v209_v4 = vld [vmem:[%s1871_s1 + $0xd0] sm:$0xff] }
  0x1b   : > { %1242 = vmatprep.subr.msk.mxu0 %vm446_vm0, %v255_v13  ;;  %1319 = vmatprep.subr.msk.mxu1 %vm446_vm0, %v255_v13  ;;  %v240_v3 = vld [vmem:[%s1871_s1 + $0x1c8] sm:$0xff]  ;;  %v241_v5 = vld [vmem:[%s1871_s1 + $0x1d0] sm:$0xff]  ;;  %v210_v6 = vld [vmem:[%s1871_s1 + $0xd8] sm:$0xff] }
  0x1c   : > { %v242_v7 = vld [vmem:[%s1871_s1 + $0x1d8] sm:$0xff]  ;;  %v211_v8 = vld [vmem:[%s1871_s1 + $0xe0] sm:$0xff]  ;;  %v212_v10 = vld [vmem:[%s1871_s1 + $0xe8] sm:$0xff] }
  0x1d   : > { %v243_v9 = vld [vmem:[%s1871_s1 + $0x1e0] sm:$0xff]  ;;  %v244_v11 = vld [vmem:[%s1871_s1 + $0x1e8] sm:$0xff]  ;;  %v213_v12 = vld [vmem:[%s1871_s1 + $0xf0] sm:$0xff] }
  0x1e   : > { %1243 = vmatpush1.msk.msra.mxu0 %vm446_vm0, %v254_v14  ;;  %1322 = vmatpush1.msk.msra.mxu1 %vm446_vm0, %v254_v14  ;;  %v245_v13 = vld [vmem:[%s1871_s1 + $0x1f0] sm:$0xf]  ;;  %v214_v14 = vld [vmem:[%s1871_s1 + $0xf8] sm:$0xff] }
  0x1f   : > { %1244 = vmatmul.mubr.msk.f32.vlgmr.msra.gmra.mrb[0].mxu0 %vm256_vm1, %v183_v15  ;;  %1276 = vmatmul.mubr.msk.f32.vlgmr.msra.gmra.mrb[0].mxu1 %vm256_vm1, %v215_v16 }
  0x20   : > { %523 = vmatprep.mubr.f32.mxu0 %v1374_v0  ;;  %715 = vmatprep.mubr.f32.mxu1 %v1374_v0 }
  0x23   : > { %1245 = vmatmul.mubr.msk.f32.gmra.mrb[2].mxu0 %vm256_vm1, %v184_v17  ;;  %1277 = vmatmul.mubr.msk.f32.gmra.mrb[2].mxu1 %vm256_vm1, %v216_v18 }
  0x24   : > { %529 = vmatprep.mubr.f32.mxu0 %v1374_v0  ;;  %721 = vmatprep.mubr.f32.mxu1 %v1374_v0 }
  0x27   : > { %1246 = vmatmul.mubr.msk.f32.gmra.mrb[4].mxu0 %vm256_vm1, %v185_v19  ;;  %1278 = vmatmul.mubr.msk.f32.gmra.mrb[4].mxu1 %vm256_vm1, %v217_v20 }
  0x28   : > { %535 = vmatprep.mubr.f32.mxu0 %v1374_v0  ;;  %727 = vmatprep.mubr.f32.mxu1 %v1374_v0 }
  0x2b   : > { %1247 = vmatmul.mubr.msk.f32.gmra.mrb[6].mxu0 %vm256_vm1, %v186_v21  ;;  %1279 = vmatmul.mubr.msk.f32.gmra.mrb[6].mxu1 %vm256_vm1, %v218_v22 }
  0x2c   : > { %541 = vmatprep.mubr.f32.mxu0 %v1374_v0  ;;  %733 = vmatprep.mubr.f32.mxu1 %v1374_v0 }
  0x2f   : > { %1248 = vmatmul.mubr.msk.f32.gmra.mrb[8].mxu0 %vm256_vm1, %v187_v23  ;;  %1280 = vmatmul.mubr.msk.f32.gmra.mrb[8].mxu1 %vm256_vm1, %v219_v24 }
  0x30   : > { %547 = vmatprep.mubr.f32.mxu0 %v1374_v0  ;;  %739 = vmatprep.mubr.f32.mxu1 %v1374_v0 }
  0x33   : > { %1249 = vmatmul.mubr.msk.f32.gmra.mrb[10].mxu0 %vm256_vm1, %v188_v25  ;;  %1281 = vmatmul.mubr.msk.f32.gmra.mrb[10].mxu1 %vm256_vm1, %v220_v26 }
  0x34   : > { %553 = vmatprep.mubr.f32.mxu0 %v1374_v0  ;;  %745 = vmatprep.mubr.f32.mxu1 %v1374_v0 }
  0x37   : > { %1250 = vmatmul.mubr.msk.f32.gmra.mrb[12].mxu0 %vm256_vm1, %v189_v27  ;;  %1282 = vmatmul.mubr.msk.f32.gmra.mrb[12].mxu1 %vm256_vm1, %v221_v28 }
  0x38   : > { %559 = vmatprep.mubr.f32.mxu0 %v1374_v0  ;;  %751 = vmatprep.mubr.f32.mxu1 %v1374_v0 }
  0x3b   : > { %1251 = vmatmul.mubr.msk.f32.gmra.mrb[14].mxu0 %vm256_vm1, %v190_v29  ;;  %1283 = vmatmul.mubr.msk.f32.gmra.mrb[14].mxu1 %vm256_vm1, %v222_v30 }
  0x3c   : > { %565 = vmatprep.mubr.f32.mxu0 %v1374_v0  ;;  %757 = vmatprep.mubr.f32.mxu1 %v1374_v0 }
  0x3f   : > { %1252 = vmatmul.mubr.msk.f32.gmra.mrb[16].mxu0 %vm256_vm1, %v191_v31  ;;  %1284 = vmatmul.mubr.msk.f32.gmra.mrb[16].mxu1 %vm256_vm1, %v223_v32 }
  0x40   : > { %571 = vmatprep.mubr.f32.mxu0 %v1374_v0  ;;  %763 = vmatprep.mubr.f32.mxu1 %v1374_v0 }
  0x43   : > { %1253 = vmatmul.mubr.msk.f32.gmra.mrb[18].mxu0 %vm256_vm1, %v192_v33  ;;  %1285 = vmatmul.mubr.msk.f32.gmra.mrb[18].mxu1 %vm256_vm1, %v224_v34 }
  0x44   : > { %577 = vmatprep.mubr.f32.mxu0 %v1374_v0  ;;  %769 = vmatprep.mubr.f32.mxu1 %v1374_v0 }
  0x47   : > { %1254 = vmatmul.mubr.msk.f32.gmra.mrb[20].mxu0 %vm256_vm1, %v193_v35  ;;  %1286 = vmatmul.mubr.msk.f32.gmra.mrb[20].mxu1 %vm256_vm1, %v225_v36 }
  0x48   : > { %583 = vmatprep.mubr.f32.mxu0 %v1374_v0  ;;  %775 = vmatprep.mubr.f32.mxu1 %v1374_v0 }
  0x4b   : > { %1255 = vmatmul.mubr.msk.f32.gmra.mrb[22].mxu0 %vm256_vm1, %v194_v37  ;;  %1287 = vmatmul.mubr.msk.f32.gmra.mrb[22].mxu1 %vm256_vm1, %v226_v38 }
  0x4c   : > { %589 = vmatprep.mubr.f32.mxu0 %v1374_v0  ;;  %781 = vmatprep.mubr.f32.mxu1 %v1374_v0 }
  0x4f   : > { %1256 = vmatmul.mubr.msk.f32.gmra.mrb[24].mxu0 %vm256_vm1, %v195_v39  ;;  %1288 = vmatmul.mubr.msk.f32.gmra.mrb[24].mxu1 %vm256_vm1, %v227_v40 }
  0x50   : > { %595 = vmatprep.mubr.f32.mxu0 %v1374_v0  ;;  %787 = vmatprep.mubr.f32.mxu1 %v1374_v0 }
  0x53   : > { %1257 = vmatmul.mubr.msk.f32.gmra.mrb[26].mxu0 %vm256_vm1, %v196_v41  ;;  %1289 = vmatmul.mubr.msk.f32.gmra.mrb[26].mxu1 %vm256_vm1, %v228_v42 }
  0x54   : > { %601 = vmatprep.mubr.f32.mxu0 %v1374_v0  ;;  %793 = vmatprep.mubr.f32.mxu1 %v1374_v0 }
  0x57   : > { %1258 = vmatmul.mubr.msk.f32.gmra.mrb[28].mxu0 %vm256_vm1, %v197_v43  ;;  %1290 = vmatmul.mubr.msk.f32.gmra.mrb[28].mxu1 %vm256_vm1, %v229_v44 }
  0x58   : > { %607 = vmatprep.mubr.f32.mxu0 %v1374_v0  ;;  %799 = vmatprep.mubr.f32.mxu1 %v1374_v0 }
  0x5b   : > { %1259 = vmatmul.mubr.msk.f32.gmra.mrb[30].mxu0 %vm256_vm1, %v198_v45  ;;  %1291 = vmatmul.mubr.msk.f32.gmra.mrb[30].mxu1 %vm256_vm1, %v230_v46 }
  0x5c   : > { %613 = vmatprep.mubr.f32.mxu0 %v1374_v0  ;;  %805 = vmatprep.mubr.f32.mxu1 %v1374_v0 }
  0x5f   : > { %1260 = vmatmul.mubr.msk.f32.gmra.mrb[32].mxu0 %vm256_vm1, %v199_v47  ;;  %1292 = vmatmul.mubr.msk.f32.gmra.mrb[32].mxu1 %vm256_vm1, %v231_v48 }
  0x60   : > { %619 = vmatprep.mubr.f32.mxu0 %v1374_v0  ;;  %811 = vmatprep.mubr.f32.mxu1 %v1374_v0 }
  0x63   : > { %1261 = vmatmul.mubr.msk.f32.gmra.mrb[34].mxu0 %vm256_vm1, %v200_v49  ;;  %1293 = vmatmul.mubr.msk.f32.gmra.mrb[34].mxu1 %vm256_vm1, %v232_v50 }
  0x64   : > { %625 = vmatprep.mubr.f32.mxu0 %v1374_v0  ;;  %817 = vmatprep.mubr.f32.mxu1 %v1374_v0 }
  0x67   : > { %1262 = vmatmul.mubr.msk.f32.gmra.mrb[36].mxu0 %vm256_vm1, %v201_v51  ;;  %1294 = vmatmul.mubr.msk.f32.gmra.mrb[36].mxu1 %vm256_vm1, %v233_v52 }
  0x68   : > { %631 = vmatprep.mubr.f32.mxu0 %v1374_v0  ;;  %823 = vmatprep.mubr.f32.mxu1 %v1374_v0 }
  0x6b   : > { %1263 = vmatmul.mubr.msk.f32.gmra.mrb[38].mxu0 %vm256_vm1, %v202_v53  ;;  %1295 = vmatmul.mubr.msk.f32.gmra.mrb[38].mxu1 %vm256_vm1, %v234_v54 }
  0x6c   : > { %637 = vmatprep.mubr.f32.mxu0 %v1374_v0  ;;  %829 = vmatprep.mubr.f32.mxu1 %v1374_v0 }
  0x6f   : > { %1264 = vmatmul.mubr.msk.f32.gmra.mrb[40].mxu0 %vm256_vm1, %v203_v55  ;;  %1296 = vmatmul.mubr.msk.f32.gmra.mrb[40].mxu1 %vm256_vm1, %v235_v56 }
  0x70   : > { %643 = vmatprep.mubr.f32.mxu0 %v1374_v0  ;;  %835 = vmatprep.mubr.f32.mxu1 %v1374_v0 }
  0x73   : > { %1265 = vmatmul.mubr.msk.f32.gmra.mrb[42].mxu0 %vm256_vm1, %v204_v57  ;;  %1297 = vmatmul.mubr.msk.f32.gmra.mrb[42].mxu1 %vm256_vm1, %v236_v58 }
  0x74   : > { %649 = vmatprep.mubr.f32.mxu0 %v1374_v0  ;;  %841 = vmatprep.mubr.f32.mxu1 %v1374_v0 }
  0x77   : > { %1266 = vmatmul.mubr.msk.f32.gmra.mrb[44].mxu0 %vm256_vm1, %v205_v59  ;;  %1298 = vmatmul.mubr.msk.f32.gmra.mrb[44].mxu1 %vm256_vm1, %v237_v60 }
  0x78   : > { %655 = vmatprep.mubr.f32.mxu0 %v1374_v0  ;;  %847 = vmatprep.mubr.f32.mxu1 %v1374_v0 }
  0x7b   : > { %1267 = vmatmul.mubr.msk.f32.gmra.mrb[46].mxu0 %vm256_vm1, %v206_v61  ;;  %1299 = vmatmul.mubr.msk.f32.gmra.mrb[46].mxu1 %vm256_vm1, %v238_v62 }
  0x7c   : > { %661 = vmatprep.mubr.f32.mxu0 %v1374_v0  ;;  %853 = vmatprep.mubr.f32.mxu1 %v1374_v0 }
  0x7f   : > { %1268 = vmatmul.mubr.msk.f32.gmra.mrb[48].mxu0 %vm256_vm1, %v207_v63  ;;  %1300 = vmatmul.mubr.msk.f32.gmra.mrb[48].mxu1 %vm256_vm1, %v239_v1 }
  0x80   : > { %667 = vmatprep.mubr.f32.mxu0 %v1374_v0  ;;  %859 = vmatprep.mubr.f32.mxu1 %v1374_v0 }
  0x83   : > { %1269 = vmatmul.mubr.msk.f32.gmra.mrb[50].mxu0 %vm256_vm1, %v208_v2  ;;  %1301 = vmatmul.mubr.msk.f32.gmra.mrb[50].mxu1 %vm256_vm1, %v240_v3 }
  0x84   : > { %673 = vmatprep.mubr.f32.mxu0 %v1374_v0  ;;  %865 = vmatprep.mubr.f32.mxu1 %v1374_v0 }
  0x87   : > { %1270 = vmatmul.mubr.msk.f32.gmra.mrb[52].mxu0 %vm256_vm1, %v209_v4  ;;  %1302 = vmatmul.mubr.msk.f32.gmra.mrb[52].mxu1 %vm256_vm1, %v241_v5 }
  0x88   : > { %679 = vmatprep.mubr.f32.mxu0 %v1374_v0  ;;  %871 = vmatprep.mubr.f32.mxu1 %v1374_v0 }
  0x8b   : > { %1271 = vmatmul.mubr.msk.f32.gmra.mrb[54].mxu0 %vm256_vm1, %v210_v6  ;;  %1303 = vmatmul.mubr.msk.f32.gmra.mrb[54].mxu1 %vm256_vm1, %v242_v7 }
  0x8c   : > { %685 = vmatprep.mubr.f32.mxu0 %v1374_v0  ;;  %877 = vmatprep.mubr.f32.mxu1 %v1374_v0 }
  0x8f   : > { %1272 = vmatmul.mubr.msk.f32.gmra.mrb[56].mxu0 %vm256_vm1, %v211_v8  ;;  %1304 = vmatmul.mubr.msk.f32.gmra.mrb[56].mxu1 %vm256_vm1, %v243_v9 }
  0x90   : > { %691 = vmatprep.mubr.f32.mxu0 %v1374_v0  ;;  %883 = vmatprep.mubr.f32.mxu1 %v1374_v0 }
  0x93   : > { %1273 = vmatmul.mubr.msk.f32.gmra.mrb[58].mxu0 %vm256_vm1, %v212_v10  ;;  %1305 = vmatmul.mubr.msk.f32.gmra.mrb[58].mxu1 %vm256_vm1, %v244_v11 }
  0x94   : > { %697 = vmatprep.mubr.f32.mxu0 %v1374_v0  ;;  %889 = vmatprep.mubr.f32.mxu1 %v1374_v0 }
  0x97   : > { %1274 = vmatmul.mubr.msk.f32.gmra.mrb[60].mxu0 %vm256_vm1, %v213_v12  ;;  %1306 = vmatmul.mubr.msk.f32.gmra.mrb[60].mxu1 %vm256_vm1, %v245_v13 }
  0x98   : > { %703 = vmatprep.mubr.f32.mxu0 %v1374_v0 }
  0x9b   : > { %1275 = vmatmul.mubr.msk.f32.gmra.mrb[62].mxu0 %vm256_vm1, %v214_v14 }
  0xf2   : > { %v519_v15 = vpop.f32.mrb[0].mxu0  ;;  %v711_v16 = vpop.f32.mrb[0].mxu1 }
  0xf3   : > { %v896_v17 = vmax.f32 %v519_v15, 0.0  ;;  %v521_v0 = vpop.f32.mrb[1].mxu0  ;;  %v960_v18 = vmax.f32 %v711_v16, 0.0  ;;  %v713_v19 = vpop.f32.mrb[1].mxu1 }
  0xf4   : > { %v897_v20 = vmax.f32 %v521_v0, 0.0  ;;  %v961_v21 = vmax.f32 %v713_v19, 0.0 }
  0xf5   : > { %1022 = vst [vmem:[%s1733_s26] sm:$0xff] %v896_v17  ;;  %1086 = vst [vmem:[%s1733_s26 + $0x200] sm:$0xff] %v960_v18 }
  0xf6   : > { %1023 = vst [vmem:[%s1733_s26 + $0x8] sm:$0xff] %v897_v20  ;;  %v525_v22 = vpop.f32.mrb[2].mxu0  ;;  %1087 = vst [vmem:[%s1733_s26 + $0x208] sm:$0xff] %v961_v21  ;;  %v717_v23 = vpop.f32.mrb[2].mxu1 }
  0xf7   : > { %v898_v24 = vmax.f32 %v525_v22, 0.0  ;;  %v527_v25 = vpop.f32.mrb[3].mxu0  ;;  %v962_v26 = vmax.f32 %v717_v23, 0.0  ;;  %v719_v27 = vpop.f32.mrb[3].mxu1 }
  0xf8   : > { %v899_v28 = vmax.f32 %v527_v25, 0.0  ;;  %v963_v29 = vmax.f32 %v719_v27, 0.0 }
  0xf9   : > { %1024 = vst [vmem:[%s1733_s26 + $0x10] sm:$0xff] %v898_v24  ;;  %1088 = vst [vmem:[%s1733_s26 + $0x210] sm:$0xff] %v962_v26 }
  0xfa   : > { %1025 = vst [vmem:[%s1733_s26 + $0x18] sm:$0xff] %v899_v28  ;;  %v531_v30 = vpop.f32.mrb[4].mxu0  ;;  %1089 = vst [vmem:[%s1733_s26 + $0x218] sm:$0xff] %v963_v29  ;;  %v723_v31 = vpop.f32.mrb[4].mxu1 }
  0xfb   : > { %v900_v32 = vmax.f32 %v531_v30, 0.0  ;;  %v533_v33 = vpop.f32.mrb[5].mxu0  ;;  %v964_v34 = vmax.f32 %v723_v31, 0.0  ;;  %v725_v35 = vpop.f32.mrb[5].mxu1 }
  0xfc   : > { %v901_v36 = vmax.f32 %v533_v33, 0.0  ;;  %v965_v37 = vmax.f32 %v725_v35, 0.0 }
  0xfd   : > { %1026 = vst [vmem:[%s1733_s26 + $0x20] sm:$0xff] %v900_v32  ;;  %1090 = vst [vmem:[%s1733_s26 + $0x220] sm:$0xff] %v964_v34 }
  0xfe   : > { %1027 = vst [vmem:[%s1733_s26 + $0x28] sm:$0xff] %v901_v36  ;;  %v537_v38 = vpop.f32.mrb[6].mxu0  ;;  %1091 = vst [vmem:[%s1733_s26 + $0x228] sm:$0xff] %v965_v37  ;;  %v729_v39 = vpop.f32.mrb[6].mxu1 }
  0xff   : > { %v902_v40 = vmax.f32 %v537_v38, 0.0  ;;  %v539_v41 = vpop.f32.mrb[7].mxu0  ;;  %v966_v42 = vmax.f32 %v729_v39, 0.0  ;;  %v731_v43 = vpop.f32.mrb[7].mxu1 }
 0x100   : > { %v903_v44 = vmax.f32 %v539_v41, 0.0  ;;  %v967_v45 = vmax.f32 %v731_v43, 0.0 }
 0x101   : > { %1028 = vst [vmem:[%s1733_s26 + $0x30] sm:$0xff] %v902_v40  ;;  %1092 = vst [vmem:[%s1733_s26 + $0x230] sm:$0xff] %v966_v42 }
 0x102   : > { %1029 = vst [vmem:[%s1733_s26 + $0x38] sm:$0xff] %v903_v44  ;;  %v543_v46 = vpop.f32.mrb[8].mxu0  ;;  %1093 = vst [vmem:[%s1733_s26 + $0x238] sm:$0xff] %v967_v45  ;;  %v735_v47 = vpop.f32.mrb[8].mxu1 }
 0x103   : > { %v904_v48 = vmax.f32 %v543_v46, 0.0  ;;  %v545_v49 = vpop.f32.mrb[9].mxu0  ;;  %v968_v50 = vmax.f32 %v735_v47, 0.0  ;;  %v737_v51 = vpop.f32.mrb[9].mxu1 }
 0x104   : > { %v905_v52 = vmax.f32 %v545_v49, 0.0  ;;  %v969_v53 = vmax.f32 %v737_v51, 0.0 }
 0x105   : > { %1030 = vst [vmem:[%s1733_s26 + $0x40] sm:$0xff] %v904_v48  ;;  %1094 = vst [vmem:[%s1733_s26 + $0x240] sm:$0xff] %v968_v50 }
 0x106   : > { %1031 = vst [vmem:[%s1733_s26 + $0x48] sm:$0xff] %v905_v52  ;;  %v549_v54 = vpop.f32.mrb[10].mxu0  ;;  %1095 = vst [vmem:[%s1733_s26 + $0x248] sm:$0xff] %v969_v53  ;;  %v741_v55 = vpop.f32.mrb[10].mxu1 }
 0x107   : > { %v906_v56 = vmax.f32 %v549_v54, 0.0  ;;  %v551_v57 = vpop.f32.mrb[11].mxu0  ;;  %v970_v58 = vmax.f32 %v741_v55, 0.0  ;;  %v743_v59 = vpop.f32.mrb[11].mxu1 }
 0x108   : > { %v907_v60 = vmax.f32 %v551_v57, 0.0  ;;  %v971_v61 = vmax.f32 %v743_v59, 0.0 }
 0x109   : > { %1032 = vst [vmem:[%s1733_s26 + $0x50] sm:$0xff] %v906_v56  ;;  %1096 = vst [vmem:[%s1733_s26 + $0x250] sm:$0xff] %v970_v58 }
 0x10a   : > { %1033 = vst [vmem:[%s1733_s26 + $0x58] sm:$0xff] %v907_v60  ;;  %v555_v62 = vpop.f32.mrb[12].mxu0  ;;  %1097 = vst [vmem:[%s1733_s26 + $0x258] sm:$0xff] %v971_v61  ;;  %v747_v63 = vpop.f32.mrb[12].mxu1 }
 0x10b   : > { %v908_v1 = vmax.f32 %v555_v62, 0.0  ;;  %v557_v2 = vpop.f32.mrb[13].mxu0  ;;  %v972_v3 = vmax.f32 %v747_v63, 0.0  ;;  %v749_v4 = vpop.f32.mrb[13].mxu1 }
 0x10c   : > { %v909_v5 = vmax.f32 %v557_v2, 0.0  ;;  %v973_v6 = vmax.f32 %v749_v4, 0.0 }
 0x10d   : > { %1034 = vst [vmem:[%s1733_s26 + $0x60] sm:$0xff] %v908_v1  ;;  %1098 = vst [vmem:[%s1733_s26 + $0x260] sm:$0xff] %v972_v3 }
 0x10e   : > { %1035 = vst [vmem:[%s1733_s26 + $0x68] sm:$0xff] %v909_v5  ;;  %v561_v7 = vpop.f32.mrb[14].mxu0  ;;  %1099 = vst [vmem:[%s1733_s26 + $0x268] sm:$0xff] %v973_v6  ;;  %v753_v8 = vpop.f32.mrb[14].mxu1 }
 0x10f   : > { %v910_v9 = vmax.f32 %v561_v7, 0.0  ;;  %v563_v10 = vpop.f32.mrb[15].mxu0  ;;  %v974_v11 = vmax.f32 %v753_v8, 0.0  ;;  %v755_v12 = vpop.f32.mrb[15].mxu1 }
 0x110   : > { %v911_v13 = vmax.f32 %v563_v10, 0.0  ;;  %v975_v14 = vmax.f32 %v755_v12, 0.0 }
 0x111   : > { %1036 = vst [vmem:[%s1733_s26 + $0x70] sm:$0xff] %v910_v9  ;;  %1100 = vst [vmem:[%s1733_s26 + $0x270] sm:$0xff] %v974_v11 }
 0x112   : > { %1037 = vst [vmem:[%s1733_s26 + $0x78] sm:$0xff] %v911_v13  ;;  %v567_v15 = vpop.f32.mrb[16].mxu0  ;;  %1101 = vst [vmem:[%s1733_s26 + $0x278] sm:$0xff] %v975_v14  ;;  %v759_v16 = vpop.f32.mrb[16].mxu1 }
 0x113   : > { %v912_v17 = vmax.f32 %v567_v15, 0.0  ;;  %v569_v0 = vpop.f32.mrb[17].mxu0  ;;  %v976_v18 = vmax.f32 %v759_v16, 0.0  ;;  %v761_v19 = vpop.f32.mrb[17].mxu1 }
 0x114   : > { %v913_v20 = vmax.f32 %v569_v0, 0.0  ;;  %v977_v21 = vmax.f32 %v761_v19, 0.0 }
 0x115   : > { %1038 = vst [vmem:[%s1733_s26 + $0x80] sm:$0xff] %v912_v17  ;;  %1102 = vst [vmem:[%s1733_s26 + $0x280] sm:$0xff] %v976_v18 }
 0x116   : > { %1039 = vst [vmem:[%s1733_s26 + $0x88] sm:$0xff] %v913_v20  ;;  %v573_v22 = vpop.f32.mrb[18].mxu0  ;;  %1103 = vst [vmem:[%s1733_s26 + $0x288] sm:$0xff] %v977_v21  ;;  %v765_v23 = vpop.f32.mrb[18].mxu1 }
 0x117   : > { %v914_v24 = vmax.f32 %v573_v22, 0.0  ;;  %v575_v25 = vpop.f32.mrb[19].mxu0  ;;  %v978_v26 = vmax.f32 %v765_v23, 0.0  ;;  %v767_v27 = vpop.f32.mrb[19].mxu1 }
 0x118   : > { %v915_v28 = vmax.f32 %v575_v25, 0.0  ;;  %v979_v29 = vmax.f32 %v767_v27, 0.0 }
 0x119   : > { %1040 = vst [vmem:[%s1733_s26 + $0x90] sm:$0xff] %v914_v24  ;;  %1104 = vst [vmem:[%s1733_s26 + $0x290] sm:$0xff] %v978_v26 }
 0x11a   : > { %1041 = vst [vmem:[%s1733_s26 + $0x98] sm:$0xff] %v915_v28  ;;  %v579_v30 = vpop.f32.mrb[20].mxu0  ;;  %1105 = vst [vmem:[%s1733_s26 + $0x298] sm:$0xff] %v979_v29  ;;  %v771_v31 = vpop.f32.mrb[20].mxu1 }
 0x11b   : > { %v916_v32 = vmax.f32 %v579_v30, 0.0  ;;  %v581_v33 = vpop.f32.mrb[21].mxu0  ;;  %v980_v34 = vmax.f32 %v771_v31, 0.0  ;;  %v773_v35 = vpop.f32.mrb[21].mxu1 }
 0x11c   : > { %v917_v36 = vmax.f32 %v581_v33, 0.0  ;;  %v981_v37 = vmax.f32 %v773_v35, 0.0 }
 0x11d   : > { %1042 = vst [vmem:[%s1733_s26 + $0xa0] sm:$0xff] %v916_v32  ;;  %1106 = vst [vmem:[%s1733_s26 + $0x2a0] sm:$0xff] %v980_v34 }
 0x11e   : > { %1043 = vst [vmem:[%s1733_s26 + $0xa8] sm:$0xff] %v917_v36  ;;  %v585_v38 = vpop.f32.mrb[22].mxu0  ;;  %1107 = vst [vmem:[%s1733_s26 + $0x2a8] sm:$0xff] %v981_v37  ;;  %v777_v39 = vpop.f32.mrb[22].mxu1 }
 0x11f   : > { %v918_v40 = vmax.f32 %v585_v38, 0.0  ;;  %v587_v41 = vpop.f32.mrb[23].mxu0  ;;  %v982_v42 = vmax.f32 %v777_v39, 0.0  ;;  %v779_v43 = vpop.f32.mrb[23].mxu1 }
 0x120   : > { %v919_v44 = vmax.f32 %v587_v41, 0.0  ;;  %v983_v45 = vmax.f32 %v779_v43, 0.0 }
 0x121   : > { %1044 = vst [vmem:[%s1733_s26 + $0xb0] sm:$0xff] %v918_v40  ;;  %1108 = vst [vmem:[%s1733_s26 + $0x2b0] sm:$0xff] %v982_v42 }
 0x122   : > { %1045 = vst [vmem:[%s1733_s26 + $0xb8] sm:$0xff] %v919_v44  ;;  %v591_v46 = vpop.f32.mrb[24].mxu0  ;;  %1109 = vst [vmem:[%s1733_s26 + $0x2b8] sm:$0xff] %v983_v45  ;;  %v783_v47 = vpop.f32.mrb[24].mxu1 }
 0x123   : > { %v920_v48 = vmax.f32 %v591_v46, 0.0  ;;  %v593_v49 = vpop.f32.mrb[25].mxu0  ;;  %v984_v50 = vmax.f32 %v783_v47, 0.0  ;;  %v785_v51 = vpop.f32.mrb[25].mxu1 }
 0x124   : > { %v921_v52 = vmax.f32 %v593_v49, 0.0  ;;  %v985_v53 = vmax.f32 %v785_v51, 0.0 }
 0x125   : > { %1046 = vst [vmem:[%s1733_s26 + $0xc0] sm:$0xff] %v920_v48  ;;  %1110 = vst [vmem:[%s1733_s26 + $0x2c0] sm:$0xff] %v984_v50 }
 0x126   : > { %1047 = vst [vmem:[%s1733_s26 + $0xc8] sm:$0xff] %v921_v52  ;;  %v597_v54 = vpop.f32.mrb[26].mxu0  ;;  %1111 = vst [vmem:[%s1733_s26 + $0x2c8] sm:$0xff] %v985_v53  ;;  %v789_v55 = vpop.f32.mrb[26].mxu1 }
 0x127   : > { %v922_v56 = vmax.f32 %v597_v54, 0.0  ;;  %v599_v57 = vpop.f32.mrb[27].mxu0  ;;  %v986_v58 = vmax.f32 %v789_v55, 0.0  ;;  %v791_v59 = vpop.f32.mrb[27].mxu1 }
 0x128   : > { %v923_v60 = vmax.f32 %v599_v57, 0.0  ;;  %v987_v61 = vmax.f32 %v791_v59, 0.0 }
 0x129   : > { %1048 = vst [vmem:[%s1733_s26 + $0xd0] sm:$0xff] %v922_v56  ;;  %1112 = vst [vmem:[%s1733_s26 + $0x2d0] sm:$0xff] %v986_v58 }
 0x12a   : > { %1049 = vst [vmem:[%s1733_s26 + $0xd8] sm:$0xff] %v923_v60  ;;  %v603_v62 = vpop.f32.mrb[28].mxu0  ;;  %1113 = vst [vmem:[%s1733_s26 + $0x2d8] sm:$0xff] %v987_v61  ;;  %v795_v63 = vpop.f32.mrb[28].mxu1 }
 0x12b   : > { %v924_v1 = vmax.f32 %v603_v62, 0.0  ;;  %v605_v2 = vpop.f32.mrb[29].mxu0  ;;  %v988_v3 = vmax.f32 %v795_v63, 0.0  ;;  %v797_v4 = vpop.f32.mrb[29].mxu1 }
 0x12c   : > { %v925_v5 = vmax.f32 %v605_v2, 0.0  ;;  %v989_v6 = vmax.f32 %v797_v4, 0.0 }
 0x12d   : > { %1050 = vst [vmem:[%s1733_s26 + $0xe0] sm:$0xff] %v924_v1  ;;  %1114 = vst [vmem:[%s1733_s26 + $0x2e0] sm:$0xff] %v988_v3 }
 0x12e   : > { %1051 = vst [vmem:[%s1733_s26 + $0xe8] sm:$0xff] %v925_v5  ;;  %v609_v7 = vpop.f32.mrb[30].mxu0  ;;  %1115 = vst [vmem:[%s1733_s26 + $0x2e8] sm:$0xff] %v989_v6  ;;  %v801_v8 = vpop.f32.mrb[30].mxu1 }
 0x12f   : > { %v926_v9 = vmax.f32 %v609_v7, 0.0  ;;  %v611_v10 = vpop.f32.mrb[31].mxu0  ;;  %v990_v11 = vmax.f32 %v801_v8, 0.0  ;;  %v803_v12 = vpop.f32.mrb[31].mxu1 }
 0x130   : > { %v927_v13 = vmax.f32 %v611_v10, 0.0  ;;  %v991_v14 = vmax.f32 %v803_v12, 0.0 }
 0x131   : > { %1052 = vst [vmem:[%s1733_s26 + $0xf0] sm:$0xff] %v926_v9  ;;  %1116 = vst [vmem:[%s1733_s26 + $0x2f0] sm:$0xff] %v990_v11 }
 0x132   : > { %1053 = vst [vmem:[%s1733_s26 + $0xf8] sm:$0xff] %v927_v13  ;;  %v615_v15 = vpop.f32.mrb[32].mxu0  ;;  %1117 = vst [vmem:[%s1733_s26 + $0x2f8] sm:$0xff] %v991_v14  ;;  %v807_v16 = vpop.f32.mrb[32].mxu1 }
 0x133   : > { %v928_v17 = vmax.f32 %v615_v15, 0.0  ;;  %v617_v0 = vpop.f32.mrb[33].mxu0  ;;  %v992_v18 = vmax.f32 %v807_v16, 0.0  ;;  %v809_v19 = vpop.f32.mrb[33].mxu1 }
 0x134   : > { %v929_v20 = vmax.f32 %v617_v0, 0.0  ;;  %v993_v21 = vmax.f32 %v809_v19, 0.0 }
 0x135   : > { %1054 = vst [vmem:[%s1733_s26 + $0x100] sm:$0xff] %v928_v17  ;;  %1118 = vst [vmem:[%s1733_s26 + $0x300] sm:$0xff] %v992_v18 }
 0x136   : > { %1055 = vst [vmem:[%s1733_s26 + $0x108] sm:$0xff] %v929_v20  ;;  %v621_v22 = vpop.f32.mrb[34].mxu0  ;;  %1119 = vst [vmem:[%s1733_s26 + $0x308] sm:$0xff] %v993_v21  ;;  %v813_v23 = vpop.f32.mrb[34].mxu1 }
 0x137   : > { %v930_v24 = vmax.f32 %v621_v22, 0.0  ;;  %v623_v25 = vpop.f32.mrb[35].mxu0  ;;  %v994_v26 = vmax.f32 %v813_v23, 0.0  ;;  %v815_v27 = vpop.f32.mrb[35].mxu1 }
 0x138   : > { %v931_v28 = vmax.f32 %v623_v25, 0.0  ;;  %v995_v29 = vmax.f32 %v815_v27, 0.0 }
 0x139   : > { %1056 = vst [vmem:[%s1733_s26 + $0x110] sm:$0xff] %v930_v24  ;;  %1120 = vst [vmem:[%s1733_s26 + $0x310] sm:$0xff] %v994_v26 }
 0x13a   : > { %1057 = vst [vmem:[%s1733_s26 + $0x118] sm:$0xff] %v931_v28  ;;  %v627_v30 = vpop.f32.mrb[36].mxu0  ;;  %1121 = vst [vmem:[%s1733_s26 + $0x318] sm:$0xff] %v995_v29  ;;  %v819_v31 = vpop.f32.mrb[36].mxu1 }
 0x13b   : > { %v932_v32 = vmax.f32 %v627_v30, 0.0  ;;  %v629_v33 = vpop.f32.mrb[37].mxu0  ;;  %v996_v34 = vmax.f32 %v819_v31, 0.0  ;;  %v821_v35 = vpop.f32.mrb[37].mxu1 }
 0x13c   : > { %v933_v36 = vmax.f32 %v629_v33, 0.0  ;;  %v997_v37 = vmax.f32 %v821_v35, 0.0 }
 0x13d   : > { %1058 = vst [vmem:[%s1733_s26 + $0x120] sm:$0xff] %v932_v32  ;;  %1122 = vst [vmem:[%s1733_s26 + $0x320] sm:$0xff] %v996_v34 }
 0x13e   : > { %1059 = vst [vmem:[%s1733_s26 + $0x128] sm:$0xff] %v933_v36  ;;  %v633_v38 = vpop.f32.mrb[38].mxu0  ;;  %1123 = vst [vmem:[%s1733_s26 + $0x328] sm:$0xff] %v997_v37  ;;  %v825_v39 = vpop.f32.mrb[38].mxu1 }
 0x13f   : > { %v934_v40 = vmax.f32 %v633_v38, 0.0  ;;  %v635_v41 = vpop.f32.mrb[39].mxu0  ;;  %v998_v42 = vmax.f32 %v825_v39, 0.0  ;;  %v827_v43 = vpop.f32.mrb[39].mxu1 }
 0x140   : > { %v935_v44 = vmax.f32 %v635_v41, 0.0  ;;  %v999_v45 = vmax.f32 %v827_v43, 0.0 }
 0x141   : > { %1060 = vst [vmem:[%s1733_s26 + $0x130] sm:$0xff] %v934_v40  ;;  %1124 = vst [vmem:[%s1733_s26 + $0x330] sm:$0xff] %v998_v42 }
 0x142   : > { %1061 = vst [vmem:[%s1733_s26 + $0x138] sm:$0xff] %v935_v44  ;;  %v639_v46 = vpop.f32.mrb[40].mxu0  ;;  %1125 = vst [vmem:[%s1733_s26 + $0x338] sm:$0xff] %v999_v45  ;;  %v831_v47 = vpop.f32.mrb[40].mxu1 }
 0x143   : > { %v936_v48 = vmax.f32 %v639_v46, 0.0  ;;  %v641_v49 = vpop.f32.mrb[41].mxu0  ;;  %v1000_v50 = vmax.f32 %v831_v47, 0.0  ;;  %v833_v51 = vpop.f32.mrb[41].mxu1 }
 0x144   : > { %v937_v52 = vmax.f32 %v641_v49, 0.0  ;;  %v1001_v53 = vmax.f32 %v833_v51, 0.0 }
 0x145   : > { %1062 = vst [vmem:[%s1733_s26 + $0x140] sm:$0xff] %v936_v48  ;;  %1126 = vst [vmem:[%s1733_s26 + $0x340] sm:$0xff] %v1000_v50 }
 0x146   : > { %1063 = vst [vmem:[%s1733_s26 + $0x148] sm:$0xff] %v937_v52  ;;  %v645_v54 = vpop.f32.mrb[42].mxu0  ;;  %1127 = vst [vmem:[%s1733_s26 + $0x348] sm:$0xff] %v1001_v53  ;;  %v837_v55 = vpop.f32.mrb[42].mxu1 }
 0x147   : > { %v938_v56 = vmax.f32 %v645_v54, 0.0  ;;  %v647_v57 = vpop.f32.mrb[43].mxu0  ;;  %v1002_v58 = vmax.f32 %v837_v55, 0.0  ;;  %v839_v59 = vpop.f32.mrb[43].mxu1 }
 0x148   : > { %v939_v60 = vmax.f32 %v647_v57, 0.0  ;;  %v1003_v61 = vmax.f32 %v839_v59, 0.0 }
 0x149   : > { %1064 = vst [vmem:[%s1733_s26 + $0x150] sm:$0xff] %v938_v56  ;;  %1128 = vst [vmem:[%s1733_s26 + $0x350] sm:$0xff] %v1002_v58 }
 0x14a   : > { %1065 = vst [vmem:[%s1733_s26 + $0x158] sm:$0xff] %v939_v60  ;;  %v651_v62 = vpop.f32.mrb[44].mxu0  ;;  %1129 = vst [vmem:[%s1733_s26 + $0x358] sm:$0xff] %v1003_v61  ;;  %v843_v63 = vpop.f32.mrb[44].mxu1 }
 0x14b   : > { %v940_v1 = vmax.f32 %v651_v62, 0.0  ;;  %v653_v2 = vpop.f32.mrb[45].mxu0  ;;  %v1004_v3 = vmax.f32 %v843_v63, 0.0  ;;  %v845_v4 = vpop.f32.mrb[45].mxu1 }
 0x14c   : > { %v941_v5 = vmax.f32 %v653_v2, 0.0  ;;  %v1005_v6 = vmax.f32 %v845_v4, 0.0 }
 0x14d   : > { %1066 = vst [vmem:[%s1733_s26 + $0x160] sm:$0xff] %v940_v1  ;;  %1130 = vst [vmem:[%s1733_s26 + $0x360] sm:$0xff] %v1004_v3 }
 0x14e   : > { %1067 = vst [vmem:[%s1733_s26 + $0x168] sm:$0xff] %v941_v5  ;;  %v657_v7 = vpop.f32.mrb[46].mxu0  ;;  %1131 = vst [vmem:[%s1733_s26 + $0x368] sm:$0xff] %v1005_v6  ;;  %v849_v8 = vpop.f32.mrb[46].mxu1 }
 0x14f   : > { %v942_v9 = vmax.f32 %v657_v7, 0.0  ;;  %v659_v10 = vpop.f32.mrb[47].mxu0  ;;  %v1006_v11 = vmax.f32 %v849_v8, 0.0  ;;  %v851_v12 = vpop.f32.mrb[47].mxu1 }
 0x150   : > { %v943_v13 = vmax.f32 %v659_v10, 0.0  ;;  %v1007_v14 = vmax.f32 %v851_v12, 0.0 }
 0x151   : > { %1068 = vst [vmem:[%s1733_s26 + $0x170] sm:$0xff] %v942_v9  ;;  %1132 = vst [vmem:[%s1733_s26 + $0x370] sm:$0xff] %v1006_v11 }
 0x152   : > { %1069 = vst [vmem:[%s1733_s26 + $0x178] sm:$0xff] %v943_v13  ;;  %v663_v15 = vpop.f32.mrb[48].mxu0  ;;  %1133 = vst [vmem:[%s1733_s26 + $0x378] sm:$0xff] %v1007_v14  ;;  %v855_v16 = vpop.f32.mrb[48].mxu1 }
 0x153   : > { %v944_v17 = vmax.f32 %v663_v15, 0.0  ;;  %v665_v0 = vpop.f32.mrb[49].mxu0  ;;  %v1008_v18 = vmax.f32 %v855_v16, 0.0  ;;  %v857_v19 = vpop.f32.mrb[49].mxu1 }
 0x154   : > { %v945_v20 = vmax.f32 %v665_v0, 0.0  ;;  %v1009_v21 = vmax.f32 %v857_v19, 0.0 }
 0x155   : > { %1070 = vst [vmem:[%s1733_s26 + $0x180] sm:$0xff] %v944_v17  ;;  %1134 = vst [vmem:[%s1733_s26 + $0x380] sm:$0xff] %v1008_v18 }
 0x156   : > { %1071 = vst [vmem:[%s1733_s26 + $0x188] sm:$0xff] %v945_v20  ;;  %v669_v22 = vpop.f32.mrb[50].mxu0  ;;  %1135 = vst [vmem:[%s1733_s26 + $0x388] sm:$0xff] %v1009_v21  ;;  %v861_v23 = vpop.f32.mrb[50].mxu1 }
 0x157   : > { %v946_v24 = vmax.f32 %v669_v22, 0.0  ;;  %v671_v25 = vpop.f32.mrb[51].mxu0  ;;  %v1010_v26 = vmax.f32 %v861_v23, 0.0  ;;  %v863_v27 = vpop.f32.mrb[51].mxu1 }
 0x158   : > { %v947_v28 = vmax.f32 %v671_v25, 0.0  ;;  %v1011_v29 = vmax.f32 %v863_v27, 0.0 }
 0x159   : > { %1072 = vst [vmem:[%s1733_s26 + $0x190] sm:$0xff] %v946_v24  ;;  %1136 = vst [vmem:[%s1733_s26 + $0x390] sm:$0xff] %v1010_v26 }
 0x15a   : > { %1073 = vst [vmem:[%s1733_s26 + $0x198] sm:$0xff] %v947_v28  ;;  %v675_v30 = vpop.f32.mrb[52].mxu0  ;;  %1137 = vst [vmem:[%s1733_s26 + $0x398] sm:$0xff] %v1011_v29  ;;  %v867_v31 = vpop.f32.mrb[52].mxu1 }
 0x15b   : > { %v948_v32 = vmax.f32 %v675_v30, 0.0  ;;  %v677_v33 = vpop.f32.mrb[53].mxu0  ;;  %v1012_v34 = vmax.f32 %v867_v31, 0.0  ;;  %v869_v35 = vpop.f32.mrb[53].mxu1 }
 0x15c   : > { %v949_v36 = vmax.f32 %v677_v33, 0.0  ;;  %v1013_v37 = vmax.f32 %v869_v35, 0.0 }
 0x15d   : > { %1074 = vst [vmem:[%s1733_s26 + $0x1a0] sm:$0xff] %v948_v32  ;;  %1138 = vst [vmem:[%s1733_s26 + $0x3a0] sm:$0xff] %v1012_v34 }
 0x15e   : > { %1075 = vst [vmem:[%s1733_s26 + $0x1a8] sm:$0xff] %v949_v36  ;;  %v681_v38 = vpop.f32.mrb[54].mxu0  ;;  %1139 = vst [vmem:[%s1733_s26 + $0x3a8] sm:$0xff] %v1013_v37  ;;  %v873_v39 = vpop.f32.mrb[54].mxu1 }
 0x15f   : > { %v950_v40 = vmax.f32 %v681_v38, 0.0  ;;  %v683_v41 = vpop.f32.mrb[55].mxu0  ;;  %v1014_v42 = vmax.f32 %v873_v39, 0.0  ;;  %v875_v43 = vpop.f32.mrb[55].mxu1 }
 0x160   : > { %v951_v44 = vmax.f32 %v683_v41, 0.0  ;;  %v1015_v45 = vmax.f32 %v875_v43, 0.0 }
 0x161   : > { %1076 = vst [vmem:[%s1733_s26 + $0x1b0] sm:$0xff] %v950_v40  ;;  %1140 = vst [vmem:[%s1733_s26 + $0x3b0] sm:$0xff] %v1014_v42 }
 0x162   : > { %1077 = vst [vmem:[%s1733_s26 + $0x1b8] sm:$0xff] %v951_v44  ;;  %v687_v46 = vpop.f32.mrb[56].mxu0  ;;  %1141 = vst [vmem:[%s1733_s26 + $0x3b8] sm:$0xff] %v1015_v45  ;;  %v879_v47 = vpop.f32.mrb[56].mxu1 }
 0x163   : > { %v952_v48 = vmax.f32 %v687_v46, 0.0  ;;  %v689_v49 = vpop.f32.mrb[57].mxu0  ;;  %v1016_v50 = vmax.f32 %v879_v47, 0.0  ;;  %v881_v51 = vpop.f32.mrb[57].mxu1 }
 0x164   : > { %v953_v52 = vmax.f32 %v689_v49, 0.0  ;;  %v1017_v53 = vmax.f32 %v881_v51, 0.0 }
 0x165   : > { %1078 = vst [vmem:[%s1733_s26 + $0x1c0] sm:$0xff] %v952_v48  ;;  %1142 = vst [vmem:[%s1733_s26 + $0x3c0] sm:$0xff] %v1016_v50 }
 0x166   : > { %1079 = vst [vmem:[%s1733_s26 + $0x1c8] sm:$0xff] %v953_v52  ;;  %v693_v54 = vpop.f32.mrb[58].mxu0  ;;  %1143 = vst [vmem:[%s1733_s26 + $0x3c8] sm:$0xff] %v1017_v53  ;;  %v885_v55 = vpop.f32.mrb[58].mxu1 }
 0x167   : > { %v954_v56 = vmax.f32 %v693_v54, 0.0  ;;  %v695_v57 = vpop.f32.mrb[59].mxu0  ;;  %v1018_v58 = vmax.f32 %v885_v55, 0.0  ;;  %v887_v59 = vpop.f32.mrb[59].mxu1 }
 0x168   : > { %v955_v60 = vmax.f32 %v695_v57, 0.0  ;;  %v1019_v61 = vmax.f32 %v887_v59, 0.0 }
 0x169   : > { %1080 = vst [vmem:[%s1733_s26 + $0x1d0] sm:$0xff] %v954_v56  ;;  %1144 = vst [vmem:[%s1733_s26 + $0x3d0] sm:$0xff] %v1018_v58 }
 0x16a   : > { %1081 = vst [vmem:[%s1733_s26 + $0x1d8] sm:$0xff] %v955_v60  ;;  %v699_v62 = vpop.f32.mrb[60].mxu0  ;;  %1145 = vst [vmem:[%s1733_s26 + $0x3d8] sm:$0xff] %v1019_v61  ;;  %v891_v63 = vpop.f32.mrb[60].mxu1 }
 0x16b   : > { %v956_v1 = vmax.f32 %v699_v62, 0.0  ;;  %v701_v2 = vpop.f32.mrb[61].mxu0  ;;  %v1020_v3 = vmax.f32 %v891_v63, 0.0  ;;  %v893_v4 = vpop.f32.mrb[61].mxu1 }
 0x16c   : > { %v957_v5 = vmax.f32 %v701_v2, 0.0  ;;  %v1021_v6 = vmax.f32 %v893_v4, 0.0 }
 0x16d   : > { %1082 = vst [vmem:[%s1733_s26 + $0x1e0] sm:$0xff] %v956_v1  ;;  %1146 = vst [vmem:[%s1733_s26 + $0x3e0] sm:$0xf] %v1020_v3 }
 0x16e   : > { %1083 = vst [vmem:[%s1733_s26 + $0x1e8] sm:$0xff] %v957_v5  ;;  %v705_v7 = vpop.f32.mrb[62].mxu0  ;;  %1147 = vst [vmem:[%s1733_s26 + $0x3e8] sm:$0xf] %v1021_v6 }
 0x16f   : > { %v958_v8 = vmax.f32 %v705_v7, 0.0  ;;  %v707_v9 = vpop.f32.mrb[63].mxu0 }
 0x170   : > { %v959_v10 = vmax.f32 %v707_v9, 0.0 }
 0x171   : > { %1084 = vst [vmem:[%s1733_s26 + $0x1f0] sm:$0xff] %v958_v8 }
 0x172   : > { %1085 = vst [vmem:[%s1733_s26 + $0x1f8] sm:$0xff] %v959_v10 }
 0x173 PF: > { %s12_s11 = sadd.s32 1, %s1372_s11   ;;  %s1873_s9 = smov %s1368_s10 }
 0x174   : > { %p9_p5 = scmp.ge.s32.totalorder %s12_s11, 4   ;;  %s1874_s10 = smov %s1876_s12 }
 0x176   :  { %11 = sbr.rel (!%p9_p5) target bundleno = 2 (0x2), region = 58 }

</bundles_post_ra>
